<compile_context>
chip_gen: v5e
topology: v5e:2x2
jax: 0.10.0
libtpu: 0.0.40
codegen_flags: <defaults>
</compile_context>

<pallas_src>
import jax
import jax.numpy as jnp
from jax.experimental import pallas as pl
from jax.experimental.pallas import tpu as pltpu


def _round_up(x, m):
    return (x + m - 1) // m * m


def linear_softmax_kernel(x_ref, w_ref, b_ref, o_ref):
    # x_ref: (TB, K) f32   -> cast to bf16 in VMEM (cheap VPU op, hidden under DMA/MXU)
    # w_ref: (K, C_pad) bf16, VMEM-resident (constant index_map)
    # b_ref: (1, C_pad) f32, padded classes carry -1e30 so exp() underflows to 0
    # o_ref: (TB, C) f32    -> only the real classes are written back
    x_bf = x_ref[...].astype(jnp.bfloat16)
    logits = jnp.dot(x_bf, w_ref[...], preferred_element_type=jnp.float32) + b_ref[...]

    # Numerically stable softmax along the class axis, all in f32.
    m = jnp.max(logits, axis=1, keepdims=True)
    e = jnp.exp(logits - m)
    denom = jnp.sum(e, axis=1, keepdims=True)
    probs = e * pl.reciprocal(denom, approx=True)   # EUP slot; rows sum to 1 within ~1e-3

    C = o_ref.shape[1]
    o_ref[...] = probs[:, :C].astype(o_ref.dtype)


def _choose_tile_b(B, K, C_pad):
    """Pick a batch tile that fills ~16 MiB of VMEM (incl. double buffers and f32
    intermediates) — safe on v7x's 64 MiB VMEM — while keeping >=2 tiles for the
    v7x megacore when the batch is large enough."""
    # per-row bytes: x dbl-buf f32 (8K) + bf16 cast (2K) + out dbl-buf f32 (<=8*C_pad)
    #                + f32 logits/e intermediates (~8*C_pad) + slack
    per_row = 10 * K + 16 * C_pad + 64
    budget = 16 * 1024 * 1024
    tb = max(16, min(2048, (budget // per_row) // 16 * 16))
    if B >= 32:
        # ensure at least 2 batch tiles so dimension_semantics=("parallel",)
        # actually shards across v7x's 2 TensorCores (no-op on v5e/v6e)
        tb = min(tb, _round_up(-(-B // 2), 16))
    # never bigger than one sublane-aligned tile covering the whole batch
    return min(tb, _round_up(B, 8))


@jax.jit
def linear_model_forward(x, weight, bias):
    """x: (B, im_size) f32; weight: (num_classes, im_size) f32; bias: (num_classes,) f32."""
    B, K = x.shape
    C = weight.shape[0]

    # ---- lane-dense class axis: pad to a multiple of 128 -------------------------
    C_pad = max(128, _round_up(C, 128))

    # Weight pre-transposed once to (K, C_pad) bf16: canonical MXU (M,K)x(K,N) form.
    w_t = jnp.zeros((K, C_pad), jnp.bfloat16).at[:, :C].set(weight.T.astype(jnp.bfloat16))
    # Padded classes: bias = -1e30 so exp() underflows to exactly 0 and the softmax
    # denominator over C_pad equals the denominator over the real C classes.
    b_p = jnp.full((1, C_pad), -1e30, jnp.float32).at[0, :C].set(bias.astype(jnp.float32))

    # ---- batch tiling (x stays f32 in HBM; cast happens inside the kernel) -------
    TB = _choose_tile_b(B, K, C_pad)
    B_pad = _round_up(B, TB)
    x_p = x if B_pad == B else jnp.pad(x, ((0, B_pad - B), (0, 0)))
    grid = (B_pad // TB,)

    cost = pl.CostEstimate(
        flops=2 * B_pad * K * C_pad,
        transcendentals=B_pad * C_pad,
        bytes_accessed=B_pad * K * 4 + K * C_pad * 2 + C_pad * 4 + B_pad * C * 4,
    )

    out = pl.pallas_call(
        linear_softmax_kernel,
        out_shape=jax.ShapeDtypeStruct((B_pad, C), jnp.float32),
        grid_spec=pltpu.PrefetchScalarGridSpec(
            num_scalar_prefetch=0,
            grid=grid,
            in_specs=[
                pl.BlockSpec((TB, K), lambda i: (i, 0)),       # x: streamed per batch tile
                pl.BlockSpec((K, C_pad), lambda i: (0, 0)),    # weight: VMEM-resident
                pl.BlockSpec((1, C_pad), lambda i: (0, 0)),    # bias: VMEM-resident
            ],
            # Output block last dim == C (full dim) -> only real classes hit HBM.
            out_specs=pl.BlockSpec((TB, C), lambda i: (i, 0)),
        ),
        compiler_params=pltpu.CompilerParams(
            dimension_semantics=("parallel",),      # megacore sharding on v7x
            vmem_limit_bytes=32 * 1024 * 1024,      # safe across v5e/v6e/v7x
        ),
        cost_estimate=cost,
    )(x_p, w_t, b_p)

    return out if B_pad == B else out[:B]


if __name__ == "__main__":
    # Small shapes consistent with the module: batch=8, im_size=32, num_classes=16
    B, IM_SIZE, NUM_CLASSES = 8, 32, 16

    key = jax.random.PRNGKey(0)
    kx, kw, kb = jax.random.split(key, 3)

    # Deterministic parameter init (mimic nn.Linear's uniform(-1/sqrt(in), 1/sqrt(in)))
    bound = 1.0 / (IM_SIZE ** 0.5)
    weight = jax.random.uniform(kw, (NUM_CLASSES, IM_SIZE), jnp.float32, -bound, bound)
    bias = jax.random.uniform(kb, (NUM_CLASSES,), jnp.float32, -bound, bound)

    x = jax.random.normal(kx, (B, IM_SIZE), jnp.float32)

    out = jax.block_until_ready(linear_model_forward(x, weight, bias))

    # Reference uses the same bf16-quantized x/W (the kernel does the matmul in bf16),
    # with tolerance loose enough for the EUP approx reciprocal (~1e-3).
    x_q = x.astype(jnp.bfloat16).astype(jnp.float32)
    w_q = weight.astype(jnp.bfloat16).astype(jnp.float32)
    ref = jax.nn.softmax(x_q @ w_q.T + bias, axis=1)

    assert out.shape == (B, NUM_CLASSES)
    assert jnp.allclose(out, ref, atol=5e-3), "mismatch vs reference"
    assert jnp.allclose(jnp.sum(out, axis=1), 1.0, atol=5e-3)

    print("KERNEL_OK")
</pallas_src>

<mosaic_0001>
module attributes {stable_mosaic.version = 11 : i64} {
  func.func @linear_softmax_kernel(%arg0: i32, %arg1: memref<8x32xf32, #tpu.memory_space<vmem>>, %arg2: memref<32x128xbf16, #tpu.memory_space<vmem>>, %arg3: memref<1x128xf32, #tpu.memory_space<vmem>>, %arg4: memref<8x16xf32, #tpu.memory_space<vmem>>) attributes {dimension_semantics = [#tpu.dimension_semantics<parallel>], iteration_bounds = array<i64: 1>, scalar_prefetch = 0 : i64, scratch_operands = 0 : i64, tpu.core_type = #tpu.core_type<tc>, window_params = [{transform_indices = @transform_0, window_bounds = array<i64: 8, 32>}, {pipeline_mode = #tpu.pipeline_mode<synchronous>, transform_indices = @transform_1, window_bounds = array<i64: 32, 128>}, {pipeline_mode = #tpu.pipeline_mode<synchronous>, transform_indices = @transform_2, window_bounds = array<i64: 1, 128>}, {transform_indices = @transform_3, window_bounds = array<i64: 8, 16>}]} {
    %c0 = arith.constant 0 : index
    %c0_0 = arith.constant 0 : index
    %0 = vector.load %arg1[%c0, %c0_0] : memref<8x32xf32, #tpu.memory_space<vmem>>, vector<8x32xf32>
    %1 = arith.truncf %0 : vector<8x32xf32> to vector<8x32xbf16>
    %c0_1 = arith.constant 0 : index
    %c0_2 = arith.constant 0 : index
    %2 = vector.load %arg2[%c0_1, %c0_2] : memref<32x128xbf16, #tpu.memory_space<vmem>>, vector<32x128xbf16>
    %cst = arith.constant dense<0.000000e+00> : vector<8x128xf32>
    %3 = tpu.matmul %1, %2, %cst {dimension_numbers = #tpu.dot_dimension_numbers<[1], [0], [0], [1], [0, 0, 1, 1], [], []>} : vector<8x32xbf16>, vector<32x128xbf16>, vector<8x128xf32> -> vector<8x128xf32>
    %c0_3 = arith.constant 0 : index
    %c0_4 = arith.constant 0 : index
    %4 = vector.load %arg3[%c0_3, %c0_4] : memref<1x128xf32, #tpu.memory_space<vmem>>, vector<1x128xf32>
    %5 = vector.broadcast %4 : vector<1x128xf32> to vector<8x128xf32>
    %6 = arith.addf %3, %5 : vector<8x128xf32>
    %cst_5 = arith.constant dense<0xFF800000> : vector<8xf32>
    %7 = vector.multi_reduction <maximumf>, %6, %cst_5 [1] : vector<8x128xf32> to vector<8xf32>
    %8 = vector.shape_cast %7 : vector<8xf32> to vector<8x1xf32>
    %9 = vector.broadcast %8 : vector<8x1xf32> to vector<8x128xf32>
    %10 = arith.subf %6, %9 : vector<8x128xf32>
    %11 = math.exp %10 : vector<8x128xf32>
    %cst_6 = arith.constant dense<0.000000e+00> : vector<8xf32>
    %12 = vector.multi_reduction <add>, %11, %cst_6 [1] : vector<8x128xf32> to vector<8xf32>
    %13 = vector.shape_cast %12 : vector<8xf32> to vector<8x1xf32>
    %14 = tpu.reciprocal %13 {approx = true} : vector<8x1xf32> -> vector<8x1xf32>
    %15 = vector.broadcast %14 : vector<8x1xf32> to vector<8x128xf32>
    %16 = arith.mulf %11, %15 : vector<8x128xf32>
    %17 = vector.extract_strided_slice %16 {offsets = [0, 0], sizes = [8, 16], strides = [1, 1]} : vector<8x128xf32> to vector<8x16xf32>
    %c0_7 = arith.constant 0 : index
    %c0_8 = arith.constant 0 : index
    %18 = vector.load %arg4[%c0_7, %c0_8] : memref<8x16xf32, #tpu.memory_space<vmem>>, vector<8x16xf32>
    tpu.vector_store %arg4[%c0_7, %c0_8], %17 {strides = array<i32>} : memref<8x16xf32, #tpu.memory_space<vmem>>, vector<8x16xf32>,
    return
  }
  func.func @transform_0(%arg0: i32) -> (i32, i32) {
    %c0_i32 = arith.constant 0 : i32
    %c0_i32_0 = arith.constant 0 : i32
    return %arg0, %c0_i32 : i32, i32
  }
  func.func @transform_1(%arg0: i32) -> (i32, i32) {
    %c0_i32 = arith.constant 0 : i32
    %c0_i32_0 = arith.constant 0 : i32
    %c0_i32_1 = arith.constant 0 : i32
    return %c0_i32, %c0_i32_0 : i32, i32
  }
  func.func @transform_2(%arg0: i32) -> (i32, i32) {
    %c0_i32 = arith.constant 0 : i32
    %c0_i32_0 = arith.constant 0 : i32
    %c0_i32_1 = arith.constant 0 : i32
    return %c0_i32, %c0_i32_0 : i32, i32
  }
  func.func @transform_3(%arg0: i32) -> (i32, i32) {
    %c0_i32 = arith.constant 0 : i32
    %c0_i32_0 = arith.constant 0 : i32
    return %arg0, %c0_i32 : i32, i32
  }
}

</mosaic_0001>

<bundles_post_ra>
// kernel: linear_model_forward.1
= control target key start
LH: loop header
LB: loop body
LE: loop exit
PB: predicated region body
PF: predicated region fallthrough
CT: control target
= control target key end

     0   :  { %s161_s0 = inlined_call_operand.vmem [shape: f32[8,32], index: 0, kind: input, shape index: {}]   ;;  %s162_s1 = inlined_call_operand.vmem [shape: bf16[32,128], index: 1, kind: input, shape index: {}]   ;;  %s163_s2 = inlined_call_operand.vmem [shape: f32[1,128], index: 2, kind: input, shape index: {}]   ;;  %s164_s3 = inlined_call_operand.hbm [shape: f32[8,16], index: 3, kind: output, shape index: {}]  }
   0x1   :  { %v92_v0 = vld [vmem:[%s162_s1 + $0x8] sm:$0xff] }
   0x2   :  { %8 = vsyncpa [#allocation3], 0  ;;  %48 = vmatpush.bf16.msra.mxu0 %v92_v0  ;;  %v91_v1 = vld [vmem:[%s162_s1] sm:$0xff]  ;;  %vm38_vm0 = vcmask 261120   ;;  %s73_s22 = sshll.u32 %s164_s3, 4  ;;  %vm64_vm1 = vcmask 130048   ;;  %s74_s22 = int_to_ptr.hbm [resolvable:$true] %s73_s22 }
   0x3   :  { %v16_v2 = vld [vmem:[%s161_s0] sm:$0xff]  ;;  %s125_s0 = smov [#allocation2]  }
   0x4   :  { %v17_v3 = vpack.c.bf16 %v16_v2, %v16_v2  ;;  %v94_v4 = vld [vmem:[%s163_s2] ss:$0 sm:$0xff]  ;;  %s71_s1 = sshll.u32 %s125_s0, 4  ;;  %s72_s1 = int_to_ptr.vmem [resolvable:$true] %s71_s1 }
   0x6   :  { %49 = vmatpush.bf16.msra.mxu0 %v91_v1 }
   0x9   :  { %90 = vmatmul.msk.bf16.vlgmr.msra.gmra.mxu0 %vm38_vm0, %v17_v3 }
  0x86   :  { %v51_v5 = vpop.f32.mrf.mxu0 }
  0x87   :  { %v52_v6 = vadd.f32 %v94_v4, %v51_v5 }
  0x89   :  { %55 = vmax.xlane.f32.xlu0 %v52_v6 }
  0x8e   :  { %v53_v7 = vpop.f32.mrf.mxu0 }
  0xfc   :  { %v56_v8 = vpop.xlane.xlu0 %55 }
  0xfd   :  { %v57_v9 = vsub.f32 %v52_v6, %v56_v8 }
  0xff   :  { %v58_v10 = vmul.f32 1.442695, %v57_v9 }
 0x101   :  { %95 = vpow2.f32 %v58_v10 }
 0x107   :  { %v96_v11 = vpop.eup %95 }
 0x108   :  { %60 = vadd.xlane.f32.xlu0 %v96_v11 }
 0x17b   :  { %v61_v12 = vpop.xlane.xlu0 %60 }
 0x17c   :  { %97 = vrcp.f32 %v61_v12 }
 0x182   :  { %v98_v13 = vpop.eup %97 }
 0x183   :  { %v63_v14 = vmul.f32 %v98_v13, %v96_v11 }
 0x185   :  { %65 = vst.msk [vmem:[#allocation2] sm:$0xff] %vm64_vm1, %v63_v14 }
 0x186   :  { %76 = dma.vmem_to_hbm [thread:$0]  %s72_s1, 128, %s74_s22, [#allocation3]  }
 0x187   :  { %123 = dma.done.wait [#allocation3], 128  }
 0x188   :  { %124 = vsyncadd [#allocation3], 4294967168 }
 0x189   :  { %81 = vsyncpa [#allocation3], 1 }

</bundles_post_ra>
